<compile_context>
chip_gen: v7x
topology: tpu7x:2x2x1
jax: 0.10.0
libtpu: 0.0.40
codegen_flags: <defaults>
</compile_context>

<pallas_src>
import functools

import jax
import jax.numpy as jnp
from jax import lax
from jax.experimental import pallas as pl
from jax.experimental.pallas import tpu as pltpu


def _round_up(v, m):
    return ((v + m - 1) // m) * m


def _poisson_gauss_kernel(x_ref, h_ref, g_ref, o_ref, *, half_alpha):
    """One grid step. grid = (Bp//tb, Mp//tn, Np//tk); k (reduction over N) is last.

    x_ref: (tb, tk)  image tile
    h_ref: (tn, tk)  measurement-matrix tile (H, NOT transposed)
    g_ref: (1,  tn)  shared Gaussian noise row (resident across k: block index is k-invariant)
    o_ref: (tb, tn)  float32 output block, resident across k -> used as accumulator
    """
    k = pl.program_id(2)

    @pl.when(k == 0)
    def _():
        o_ref[...] = jnp.zeros_like(o_ref)

    # (1 + x) @ H^T: the +1 is a cheap VPU add hidden under MXU/DMA; the MXU contracts
    # the shared N axis of (tb, tk) x and (tn, tk) H directly (no transpose needed).
    o_ref[...] += lax.dot_general(
        x_ref[...] + 1.0,
        h_ref[...],
        dimension_numbers=(((1,), (1,)), ((), ())),
        preferred_element_type=jnp.float32,
    )

    @pl.when(k == pl.num_programs(2) - 1)
    def _():
        y = o_ref[...] * half_alpha                   # (alpha/2) * (1 + x) @ H^T
        y = jnp.maximum(y, 0.0)                       # F.relu
        o_ref[...] = y + jnp.sqrt(y) * g_ref[...]     # same (1, tn) noise row for all batch rows


def poisson_approx_gauss_same_noise(x, H, gauss, alpha, *, tb=256, tn=512, tk=1024):
    """x: (B, N) in [-1,1]; H: (M, N); gauss: (1, M) standard-normal sample.

    Returns (B, M) float32: relu(alpha/2 * H(1+x)) + sqrt(.) * gauss.
    """
    B, N = x.shape
    M, N2 = H.shape
    assert N2 == N and gauss.shape == (1, M)

    # Clamp tiles to the (aligned) problem size so small shapes still work,
    # keeping the last-two-dim (8, 128) alignment requirements.
    tb = min(tb, _round_up(B, 8))
    tn = min(tn, _round_up(M, 128))
    tk = min(tk, _round_up(N, 128))

    Bp, Mp, Np = _round_up(B, tb), _round_up(M, tn), _round_up(N, tk)

    xp = jnp.pad(x.astype(jnp.float32), ((0, Bp - B), (0, Np - N)))
    Hp = jnp.pad(H.astype(jnp.float32), ((0, Mp - M), (0, Np - N)))
    gp = jnp.pad(gauss.astype(jnp.float32), ((0, 0), (0, Mp - M)))

    half_alpha = 0.5 * float(alpha)
    kernel = functools.partial(_poisson_gauss_kernel, half_alpha=half_alpha)

    out = pl.pallas_call(
        kernel,
        out_shape=jax.ShapeDtypeStruct((Bp, Mp), jnp.float32),
        grid_spec=pltpu.PrefetchScalarGridSpec(
            num_scalar_prefetch=0,
            grid=(Bp // tb, Mp // tn, Np // tk),
            in_specs=[
                pl.BlockSpec((tb, tk), lambda i, j, k: (i, k)),  # x tile
                pl.BlockSpec((tn, tk), lambda i, j, k: (j, k)),  # H tile (untransposed)
                pl.BlockSpec((1, tn), lambda i, j, k: (0, j)),   # shared noise row
            ],
            out_specs=pl.BlockSpec((tb, tn), lambda i, j, k: (i, j)),
        ),
        compiler_params=pltpu.CompilerParams(
            dimension_semantics=("parallel", "parallel", "arbitrary"),
            vmem_limit_bytes=48 * 1024 * 1024,
        ),
    )(xp, Hp, gp)

    return out[:B, :M]


def _reference(x, H, gauss, alpha):
    y = (x + 1.0) / 2.0
    y = y @ H.T
    y = alpha * y
    y = jnp.maximum(y, 0.0)
    return y + jnp.sqrt(y) * gauss  # (1, M) broadcasts over batch


if __name__ == "__main__":
    key = jax.random.PRNGKey(0)
    k_x, k_h, k_g = jax.random.split(key, 3)

    # Deliberately non-tile-aligned M to exercise the padding path as well.
    B, N, M = 10, 256, 120
    alpha = 10.0

    x = jax.random.uniform(k_x, (B, N), jnp.float32, minval=-1.0, maxval=1.0)
    # Synthetic measurement operator H (M, N), as in the docstring examples
    # (np.random.random([M, N]) -> uniform [0, 1)).
    H = jax.random.uniform(k_h, (M, N), jnp.float32)
    # Same noise sample for all measurements in the batch: randn(1, M).
    gauss = jax.random.normal(k_g, (1, M), jnp.float32)

    out = poisson_approx_gauss_same_noise(x, H, gauss, alpha)
    out = jax.block_until_ready(out)

    ref = _reference(x, H, gauss, alpha)
    assert out.shape == (B, M)
    assert jnp.allclose(out, ref, rtol=1e-4, atol=1e-3), "mismatch vs reference"

    print("KERNEL_OK")
</pallas_src>

<mosaic_0001>
module attributes {stable_mosaic.version = 11 : i64} {
  func.func @_poisson_gauss_kernel(%arg0: i32, %arg1: i32, %arg2: i32, %arg3: memref<16x256xf32, #tpu.memory_space<vmem>>, %arg4: memref<128x256xf32, #tpu.memory_space<vmem>>, %arg5: memref<1x128xf32, #tpu.memory_space<vmem>>, %arg6: memref<16x128xf32, #tpu.memory_space<vmem>>) attributes {dimension_semantics = [#tpu.dimension_semantics<parallel>, #tpu.dimension_semantics<parallel>, #tpu.dimension_semantics<arbitrary>], iteration_bounds = array<i64: 1, 1, 1>, scalar_prefetch = 0 : i64, scratch_operands = 0 : i64, tpu.core_type = #tpu.core_type<tc>, window_params = [{transform_indices = @transform_0, window_bounds = array<i64: 16, 256>}, {transform_indices = @transform_1, window_bounds = array<i64: 128, 256>}, {transform_indices = @transform_2, window_bounds = array<i64: 1, 128>}, {transform_indices = @transform_3, window_bounds = array<i64: 16, 128>}]} {
    %c0_i32 = arith.constant 0 : i32
    %0 = arith.cmpi eq, %arg2, %c0_i32 : i32
    %1 = arith.extui %0 : i1 to i32
    %c0_i32_0 = arith.constant 0 : i32
    %2 = arith.cmpi ne, %1, %c0_i32_0 : i32
    scf.if %2 {
      %cst_11 = arith.constant 0.000000e+00 : f32
      %14 = vector.broadcast %cst_11 : f32 to vector<16x128xf32>
      %c0_12 = arith.constant 0 : index
      %c0_13 = arith.constant 0 : index
      %15 = vector.load %arg6[%c0_12, %c0_13] : memref<16x128xf32, #tpu.memory_space<vmem>>, vector<16x128xf32>
      tpu.vector_store %arg6[%c0_12, %c0_13], %14 {strides = array<i32>} : memref<16x128xf32, #tpu.memory_space<vmem>>, vector<16x128xf32>,
    } else {
    }
    %c0 = arith.constant 0 : index
    %c0_1 = arith.constant 0 : index
    %3 = vector.load %arg6[%c0, %c0_1] : memref<16x128xf32, #tpu.memory_space<vmem>>, vector<16x128xf32>
    %c0_2 = arith.constant 0 : index
    %c0_3 = arith.constant 0 : index
    %4 = vector.load %arg3[%c0_2, %c0_3] : memref<16x256xf32, #tpu.memory_space<vmem>>, vector<16x256xf32>
    %cst = arith.constant 1.000000e+00 : f32
    %5 = vector.broadcast %cst : f32 to vector<16x256xf32>
    %6 = arith.addf %4, %5 : vector<16x256xf32>
    %c0_4 = arith.constant 0 : index
    %c0_5 = arith.constant 0 : index
    %7 = vector.load %arg4[%c0_4, %c0_5] : memref<128x256xf32, #tpu.memory_space<vmem>>, vector<128x256xf32>
    %cst_6 = arith.constant dense<0.000000e+00> : vector<16x128xf32>
    %8 = tpu.matmul %6, %7, %cst_6 {dimension_numbers = #tpu.dot_dimension_numbers<[1], [1], [0], [0], [0, 0, 1, 0], [], []>} : vector<16x256xf32>, vector<128x256xf32>, vector<16x128xf32> -> vector<16x128xf32>
    %9 = arith.addf %3, %8 : vector<16x128xf32>
    %c0_7 = arith.constant 0 : index
    %c0_8 = arith.constant 0 : index
    %10 = vector.load %arg6[%c0_7, %c0_8] : memref<16x128xf32, #tpu.memory_space<vmem>>, vector<16x128xf32>
    tpu.vector_store %arg6[%c0_7, %c0_8], %9 {strides = array<i32>} : memref<16x128xf32, #tpu.memory_space<vmem>>, vector<16x128xf32>,
    %c0_i32_9 = arith.constant 0 : i32
    %11 = arith.cmpi eq, %arg2, %c0_i32_9 : i32
    %12 = arith.extui %11 : i1 to i32
    %c0_i32_10 = arith.constant 0 : i32
    %13 = arith.cmpi ne, %12, %c0_i32_10 : i32
    scf.if %13 {
      %c0_11 = arith.constant 0 : index
      %c0_12 = arith.constant 0 : index
      %14 = vector.load %arg6[%c0_11, %c0_12] : memref<16x128xf32, #tpu.memory_space<vmem>>, vector<16x128xf32>
      %cst_13 = arith.constant 5.000000e+00 : f32
      %15 = vector.broadcast %cst_13 : f32 to vector<16x128xf32>
      %16 = arith.mulf %14, %15 : vector<16x128xf32>
      %cst_14 = arith.constant 0.000000e+00 : f32
      %17 = vector.broadcast %cst_14 : f32 to vector<16x128xf32>
      %18 = arith.maximumf %16, %17 : vector<16x128xf32>
      %19 = math.sqrt %18 : vector<16x128xf32>
      %c0_15 = arith.constant 0 : index
      %c0_16 = arith.constant 0 : index
      %20 = vector.load %arg5[%c0_15, %c0_16] : memref<1x128xf32, #tpu.memory_space<vmem>>, vector<1x128xf32>
      %21 = vector.broadcast %20 : vector<1x128xf32> to vector<16x128xf32>
      %22 = arith.mulf %19, %21 : vector<16x128xf32>
      %23 = arith.addf %18, %22 : vector<16x128xf32>
      %c0_17 = arith.constant 0 : index
      %c0_18 = arith.constant 0 : index
      %24 = vector.load %arg6[%c0_17, %c0_18] : memref<16x128xf32, #tpu.memory_space<vmem>>, vector<16x128xf32>
      tpu.vector_store %arg6[%c0_17, %c0_18], %23 {strides = array<i32>} : memref<16x128xf32, #tpu.memory_space<vmem>>, vector<16x128xf32>,
    } else {
    }
    return
  }
  func.func @transform_0(%arg0: i32, %arg1: i32, %arg2: i32) -> (i32, i32) {
    %c0_i32 = arith.constant 0 : i32
    return %arg0, %arg2 : i32, i32
  }
  func.func @transform_1(%arg0: i32, %arg1: i32, %arg2: i32) -> (i32, i32) {
    %c0_i32 = arith.constant 0 : i32
    return %arg1, %arg2 : i32, i32
  }
  func.func @transform_2(%arg0: i32, %arg1: i32, %arg2: i32) -> (i32, i32) {
    %c0_i32 = arith.constant 0 : i32
    %c0_i32_0 = arith.constant 0 : i32
    return %c0_i32, %arg1 : i32, i32
  }
  func.func @transform_3(%arg0: i32, %arg1: i32, %arg2: i32) -> (i32, i32) {
    %c0_i32 = arith.constant 0 : i32
    return %arg0, %arg1 : i32, i32
  }
}

</mosaic_0001>

<bundles_post_ra>
// kernel: tpu_custom_call.1
= control target key start
LH: loop header
LB: loop body
LE: loop exit
PB: predicated region body
PF: predicated region fallthrough
CT: control target
= control target key end

     0   :  { %8 = vsyncpa [#allocation3], 0  ;;  %s423_s0 = inlined_call_operand.hbm [shape: f32[16,256], index: 0, kind: input, shape index: {}]   ;;  %s424_s1 = inlined_call_operand.hbm [shape: f32[128,256], index: 1, kind: input, shape index: {}]   ;;  %s425_s2 = inlined_call_operand.vmem [shape: f32[1,128], index: 2, kind: input, shape index: {}]   ;;  %s426_s3 = inlined_call_operand.hbm [shape: f32[16,128], index: 3, kind: output, shape index: {}]  }
   0x1   :  { %9 = vsyncpa [#allocation6], 0 }
   0x2   :  { %10 = vsyncpa [#allocation4], 0  ;;  %s357_s12 = smov [#allocation2]   ;;  %s285_s16 = scalar_lea.hbm %s423_s0, 512 }
   0x3   :  { %s16_s13 = sshll.u32 %s357_s12, 4  ;;  %p286_p0 = scmp.ne.s32.totalorder %s423_s0, %s285_s16  ;;  %s17_s13 = int_to_ptr.vmem [resolvable:$true] %s16_s13 }
   0x4   :  { %p289_p1 = scmp.lt.u32.totalorder %s285_s16, %s423_s0 }
   0x6   :  { %p291_p2 = pnand %p289_p1, %p286_p0 }
   0x8   :  { %294 = shalt.err (!%p291_p2)
}
   0x9   :  { %s295_s21 = scalar_lea.vmem %s17_s13, 512  ;;  %p300_p4 = scmp.lt.s32.totalorder %s17_s13, %s17_s13 }
   0xa   :  { %p296_p3 = scmp.ne.s32.totalorder %s17_s13, %s295_s21  ;;  %p301_p5 = scmp.lt.s32.totalorder %s295_s21, %s295_s21 }
   0xc   :  { %p302_p6 = por %p301_p5, %p300_p4 }
   0xe   :  { %p303_p7 = pnand %p302_p6, %p296_p3 }
  0x10   :  { %306 = shalt.err (!%p303_p7)
}
  0x11   :  { %s358_s22 = smov 256   ;;  %s359_s23 = smov 16  }
  0x12   :  { %22 = dma.hbm_to_vmem [thread:$0]  %s423_s0, 512, %s17_s13, [#allocation3], %s358_s22, %s358_s22, %s359_s23  }
  0x13   :  { %s360_s26 = smov [#allocation5]   ;;  %s307_s30 = scalar_lea.hbm %s424_s1, 4096 }
  0x14   :  { %s28_s27 = sshll.u32 %s360_s26, 4  ;;  %p308_p8 = scmp.ne.s32.totalorder %s424_s1, %s307_s30  ;;  %s29_s27 = int_to_ptr.vmem [resolvable:$true] %s28_s27 }
  0x15   :  { %p311_p9 = scmp.lt.u32.totalorder %s307_s30, %s424_s1 }
  0x17   :  { %p313_p10 = pnand %p311_p9, %p308_p8 }
  0x19   :  { %316 = shalt.err (!%p313_p10)
}
  0x1a   :  { %s317_s8 = scalar_lea.vmem %s29_s27, 4096  ;;  %p322_p12 = scmp.lt.s32.totalorder %s29_s27, %s29_s27 }
  0x1b   :  { %p318_p11 = scmp.ne.s32.totalorder %s29_s27, %s317_s8  ;;  %p323_p13 = scmp.lt.s32.totalorder %s317_s8, %s317_s8 }
  0x1d   :  { %p324_p0 = por %p323_p13, %p322_p12 }
  0x1f   :  { %p325_p1 = pnand %p324_p0, %p318_p11 }
  0x21   :  { %328 = shalt.err (!%p325_p1)
}
  0x22   :  { %34 = dma.hbm_to_vmem [thread:$0]  %s424_s1, 4096, %s29_s27, [#allocation6], %s358_s22, %s358_s22, %s359_s23  }
  0x23   :  { %351 = dma.done.wait [#allocation3], 512  }
  0x24   :  { %352 = vsyncadd [#allocation3], 4294966784 }
  0x25   :  { %353 = dma.done.wait [#allocation6], 4096  }
  0x26   :  { %354 = vsyncadd [#allocation6], 4294963200  ;;  %v60_v0 = vld [vmem:[#allocation5 + $0x8] sm:$0xff]  ;;  %v62_v1 = vld [vmem:[#allocation5 + $0x18] sm:$0xff]  ;;  %s361_s11 = smov [#allocation7]  }
  0x27   :  { %v59_v2 = vld [vmem:[#allocation5] sm:$0xff]  ;;  %v225_v3 = vpack.c.bf16 %v62_v1, %v60_v0  ;;  %v61_v4 = vld [vmem:[#allocation5 + $0x10] sm:$0xff]  ;;  %v64_v5 = vld [vmem:[#allocation5 + $0x28] sm:$0xff]  ;;  %s211_s12 = sshll.u32 %s361_s11, 4  ;;  %s212_s12 = int_to_ptr.vmem [resolvable:$true] %s211_s12 }
  0x28   :  { %v66_v6 = vld [vmem:[#allocation5 + $0x38] sm:$0xff]  ;;  %v227_v7 = vpack.c.bf16 %v61_v4, %v59_v2  ;;  %v63_v9 = vld [vmem:[#allocation5 + $0x20] sm:$0xff]  ;;  %v65_v10 = vld [vmem:[#allocation5 + $0x30] sm:$0xff]  ;;  %s329_s13 = scalar_lea.vmem %s212_s12, 256  ;;  %p334_p3 = scmp.lt.s32.totalorder %s212_s12, %s212_s12 }
  0x29   :  { %v229_v8 = vpack.c.bf16 %v66_v6, %v64_v5  ;;  %226 = vmatprep.subr.bf16.mxu0 %v225_v3  ;;  %257 = vmatprep.subr.bf16.mxu1 %v225_v3  ;;  %v68_v11 = vld [vmem:[#allocation5 + $0x48] sm:$0xff]  ;;  %v70_v12 = vld [vmem:[#allocation5 + $0x58] sm:$0xff]  ;;  %v231_v13 = vpack.c.bf16 %v65_v10, %v63_v9  ;;  %v67_v19 = vld [vmem:[#allocation5 + $0x40] sm:$0xff]  ;;  %p330_p2 = scmp.ne.s32.totalorder %s212_s12, %s329_s13  ;;  %p335_p4 = scmp.lt.s32.totalorder %s329_s13, %s329_s13 }
  0x2a   :  { %228 = vmatpush1.bf16.xpose.msra.mxu0 %v227_v7  ;;  %265 = vmatpush1.bf16.xpose.msra.mxu1 %v227_v7  ;;  %v233_v14 = vpack.c.bf16 %v70_v12, %v68_v11  ;;  %v52_v15 = vld [vmem:[#allocation2 + $0x8] sm:$0xff]  ;;  %v54_v17 = vld [vmem:[#allocation2 + $0x18] sm:$0xff]  ;;  %v69_v20 = vld [vmem:[#allocation5 + $0x50] sm:$0xff] }
  0x2b   :  { %230 = vmatprep.subr.bf16.mxu0 %v229_v8  ;;  %258 = vmatprep.subr.bf16.mxu1 %v229_v8  ;;  %v56_v16 = vadd.f32 1.0, %v52_v15  ;;  %v58_v18 = vadd.f32 1.0, %v54_v17  ;;  %v72_v21 = vld [vmem:[#allocation5 + $0x68] sm:$0xff]  ;;  %v74_v22 = vld [vmem:[#allocation5 + $0x78] sm:$0xff]  ;;  %v235_v23 = vpack.c.bf16 %v69_v20, %v67_v19  ;;  %v71_v25 = vld [vmem:[#allocation5 + $0x60] sm:$0xff]  ;;  %p336_p5 = por %p335_p4, %p334_p3 }
  0x2c   :  { %v237_v24 = vpack.c.bf16 %v74_v22, %v72_v21  ;;  %v73_v26 = vld [vmem:[#allocation5 + $0x70] sm:$0xff]  ;;  %v76_v27 = vld [vmem:[#allocation5 + $0x88] sm:$0xff]  ;;  %v78_v28 = vld [vmem:[#allocation5 + $0x98] sm:$0xff] }
  0x2d   :  { %155 = vmatprep.mubr.f32.mxu0 %v56_v16  ;;  %160 = vmatprep.mubr.f32.mxu1 %v58_v18  ;;  %v239_v29 = vpack.c.bf16 %v73_v26, %v71_v25  ;;  %v241_v30 = vpack.c.bf16 %v78_v28, %v76_v27  ;;  %v75_v31 = vld [vmem:[#allocation5 + $0x80] sm:$0xff]  ;;  %v77_v32 = vld [vmem:[#allocation5 + $0x90] sm:$0xff]  ;;  %v80_v33 = vld [vmem:[#allocation5 + $0xa8] sm:$0xff]  ;;  %p337_p6 = pnand %p336_p5, %p330_p2 }
  0x2e   :  { %v82_v34 = vld [vmem:[#allocation5 + $0xb8] sm:$0xff]  ;;  %v243_v35 = vpack.c.bf16 %v77_v32, %v75_v31  ;;  %v79_v37 = vld [vmem:[#allocation5 + $0xa0] sm:$0xff]  ;;  %v81_v38 = vld [vmem:[#allocation5 + $0xb0] sm:$0xff] }
  0x2f   :  { %v245_v36 = vpack.c.bf16 %v82_v34, %v80_v33  ;;  %v84_v39 = vld [vmem:[#allocation5 + $0xc8] sm:$0xff]  ;;  %v86_v40 = vld [vmem:[#allocation5 + $0xd8] sm:$0xff]  ;;  %v247_v41 = vpack.c.bf16 %v81_v38, %v79_v37  ;;  %v83_v43 = vld [vmem:[#allocation5 + $0xc0] sm:$0xff] }
  0x30   :  { %v249_v42 = vpack.c.bf16 %v86_v40, %v84_v39  ;;  %v85_v44 = vld [vmem:[#allocation5 + $0xd0] sm:$0xff]  ;;  %v88_v45 = vld [vmem:[#allocation5 + $0xe8] sm:$0xff]  ;;  %v90_v46 = vld [vmem:[#allocation5 + $0xf8] sm:$0xff] }
  0x31   :  { %v251_v47 = vpack.c.bf16 %v85_v44, %v83_v43  ;;  %v253_v48 = vpack.c.bf16 %v90_v46, %v88_v45  ;;  %v87_v49 = vld [vmem:[#allocation5 + $0xe0] sm:$0xff]  ;;  %v89_v50 = vld [vmem:[#allocation5 + $0xf0] sm:$0xff] }
  0x32   :  { %232 = vmatpush1.bf16.xpose.msra.mxu0 %v231_v13  ;;  %266 = vmatpush1.bf16.xpose.msra.mxu1 %v231_v13  ;;  %v255_v51 = vpack.c.bf16 %v89_v50, %v87_v49  ;;  %v51_v52 = vld [vmem:[#allocation2] sm:$0xff]  ;;  %v53_v53 = vld [vmem:[#allocation2 + $0x10] sm:$0xff] }
  0x33   :  { %234 = vmatprep.subr.bf16.mxu0 %v233_v14  ;;  %259 = vmatprep.subr.bf16.mxu1 %v233_v14  ;;  %v55_v54 = vadd.f32 1.0, %v51_v52  ;;  %v57_v55 = vadd.f32 1.0, %v53_v53  ;;  %v224_v5 = vld [vmem:[%s425_s2] ss:$0 sm:$0xff] }
  0x3a   :  { %236 = vmatpush1.bf16.xpose.msra.mxu0 %v235_v23  ;;  %267 = vmatpush1.bf16.xpose.msra.mxu1 %v235_v23 }
  0x3b   :  { %238 = vmatprep.subr.bf16.mxu0 %v237_v24  ;;  %260 = vmatprep.subr.bf16.mxu1 %v237_v24 }
  0x42   :  { %240 = vmatpush1.bf16.xpose.msra.mxu0 %v239_v29  ;;  %268 = vmatpush1.bf16.xpose.msra.mxu1 %v239_v29 }
  0x43   :  { %242 = vmatprep.subr.bf16.mxu0 %v241_v30  ;;  %261 = vmatprep.subr.bf16.mxu1 %v241_v30 }
  0x4a   :  { %244 = vmatpush1.bf16.xpose.msra.mxu0 %v243_v35  ;;  %269 = vmatpush1.bf16.xpose.msra.mxu1 %v243_v35 }
  0x4b   :  { %246 = vmatprep.subr.bf16.mxu0 %v245_v36  ;;  %262 = vmatprep.subr.bf16.mxu1 %v245_v36 }
  0x52   :  { %248 = vmatpush1.bf16.xpose.msra.mxu0 %v247_v41  ;;  %270 = vmatpush1.bf16.xpose.msra.mxu1 %v247_v41 }
  0x53   :  { %250 = vmatprep.subr.bf16.mxu0 %v249_v42  ;;  %263 = vmatprep.subr.bf16.mxu1 %v249_v42 }
  0x5a   :  { %252 = vmatpush1.bf16.xpose.msra.mxu0 %v251_v47  ;;  %271 = vmatpush1.bf16.xpose.msra.mxu1 %v251_v47 }
  0x5b   :  { %254 = vmatprep.subr.bf16.mxu0 %v253_v48  ;;  %264 = vmatprep.subr.bf16.mxu1 %v253_v48 }
  0x62   :  { %256 = vmatpush1.bf16.xpose.msra.mxu0 %v255_v51  ;;  %272 = vmatpush1.bf16.xpose.msra.mxu1 %v255_v51 }
  0x69   :  { %156 = vmatmul.mubr.f32.vlgmr.msra.gmra.mrb[0].mxu0 %v55_v54  ;;  %161 = vmatmul.mubr.f32.vlgmr.msra.gmra.mrb[0].mxu1 %v57_v55 }
 0x13c   :  { %v157_v56 = vpop.f32.mrb[0].mxu0  ;;  %v162_v57 = vpop.f32.mrb[0].mxu1 }
 0x13d   :  { %v159_v58 = vpop.f32.mrb[1].mxu0  ;;  %v164_v59 = vpop.f32.mrb[1].mxu1  ;;  %v175_v60 = vmul.f32 5.0, %v157_v56  ;;  %v176_v61 = vmul.f32 5.0, %v162_v57 }
 0x13f   :  { %v177_v62 = vmax.f32 %v175_v60, 0.0  ;;  %v178_v63 = vmax.f32 %v176_v61, 0.0 }
 0x141   :  { %281 = vrsqrt.f32 %v177_v62  ;;  %vm181_vm0 = vcmp.eq.f32.partialorder %v177_v62, inf  ;;  %v184_v3 = vand.u32 2147483648, %v177_v62  ;;  %vm183_vm1 = vcmp.eq.f32.partialorder %v177_v62, 0.0 }
 0x142   :  { %283 = vrsqrt.f32 %v178_v63  ;;  %vm188_vm2 = vcmp.eq.f32.partialorder %v178_v63, inf  ;;  %v191_v7 = vand.u32 2147483648, %v178_v63  ;;  %vm190_vm3 = vcmp.eq.f32.partialorder %v178_v63, 0.0 }
 0x14b   :  { %v282_v0 = vpop.eup %281 }
 0x14c   :  { %v284_v1 = vpop.eup %283  ;;  %v180_v2 = vmul.f32 %v282_v0, %v177_v62 }
 0x14d   :  { %v187_v4 = vmul.f32 %v284_v1, %v178_v63 }
 0x14e   :  { %v182_v6 = vsel %vm181_vm0, %v177_v62, %v180_v2 }
 0x14f   :  { %v185_v8 = vsel %vm183_vm1, %v184_v3, %v182_v6  ;;  %v189_v9 = vsel %vm188_vm2, %v178_v63, %v187_v4 }
 0x150   :  { %v192_v10 = vsel %vm190_vm3, %v191_v7, %v189_v9  ;;  %v200_v11 = vmul.f32 %v224_v5, %v185_v8 }
 0x151   :  { %v201_v12 = vmul.f32 %v224_v5, %v192_v10 }
 0x152   :  { %v202_v13 = vadd.f32 %v200_v11, %v177_v62 }
 0x153   :  { %v203_v14 = vadd.f32 %v201_v12, %v178_v63 }
 0x154   :  { %204 = vst [vmem:[#allocation7] sm:$0xff] %v202_v13 }
 0x155   :  { %205 = vst [vmem:[#allocation7 + $0x8] sm:$0xff] %v203_v14 }
 0x156   :  { %340 = shalt.err (!%p337_p6)
}
 0x157   :  { %s341_s15 = scalar_lea.hbm %s426_s3, 256 }
 0x158   :  { %p342_p7 = scmp.ne.s32.totalorder %s426_s3, %s341_s15  ;;  %p345_p8 = scmp.lt.u32.totalorder %s341_s15, %s426_s3 }
 0x15a   :  { %p347_p9 = pnand %p345_p8, %p342_p7 }
 0x15c   :  { %350 = shalt.err (!%p347_p9)
}
 0x15d   :  { %s362_s20 = smov 128   ;;  %s363_s21 = smov 8  }
 0x15e   :  { %217 = dma.vmem_to_hbm [thread:$0]  %s212_s12, 256, %s426_s3, [#allocation4], %s362_s20, %s362_s20, %s363_s21  }
 0x15f   :  { %355 = dma.done.wait [#allocation4], 256  }
 0x160   :  { %356 = vsyncadd [#allocation4], 4294967040 }
 0x161   :  { %221 = vsyncpa [#allocation3], 1 }
 0x162   :  { %222 = vsyncpa [#allocation6], 1 }
 0x163   :  { %223 = vsyncpa [#allocation4], 1 }

</bundles_post_ra>
